<compile_context>
chip_gen: v6e
topology: v6e:2x2x1
jax: 0.10.0
libtpu: 0.0.40
codegen_flags: <defaults>
</compile_context>

<pallas_src>
import functools
import math

import jax
import jax.numpy as jnp
import numpy as np
from jax.experimental import pallas as pl
from jax.experimental.pallas import tpu as pltpu


# -----------------------------------------------------------------------------
# Pallas kernel: fused pushnet/graspnet head, one (head, rotation) slab / step
#   BN2d(2048, train) -> ReLU -> 1x1 conv 2048->64 -> BN2d(64, train) -> ReLU
#   -> 1x1 conv 64->3 (padded to 128 output lanes)
# -----------------------------------------------------------------------------
def _head_kernel(x_ref, w0_ref, w1_ref, o_ref, *, p_true):
    eps = 1e-5
    x = x_ref[0, 0]                                  # (P_pad, 2048) f32
    p_pad = x.shape[0]
    inv_p = 1.0 / p_true                             # true pixel count (static)

    # --- BatchNorm2d(2048), training mode, single pass over the slab.
    # Padded rows are zero, so sums are exact; divide by the true pixel count.
    s0 = jnp.sum(x, axis=0, keepdims=True)
    q0 = jnp.sum(x * x, axis=0, keepdims=True)
    mean0 = s0 * inv_p
    var0 = jnp.maximum(q0 * inv_p - mean0 * mean0, 0.0)
    inv_std0 = jax.lax.rsqrt(var0 + eps)             # (1, 2048)

    # ReLU((x - mean) * s) == ReLU(x - mean) * s  (s > 0); gamma=1, beta=0.
    xh = jnp.maximum(x - mean0, 0.0) * inv_std0
    if p_pad > p_true:
        # Zero padded rows so their matmul outputs are exactly zero and do not
        # bias the second BatchNorm's statistics.
        rows = jax.lax.broadcasted_iota(jnp.int32, (p_pad, 1), 0)
        xh = jnp.where(rows < p_true, xh, 0.0)

    # --- 1x1 conv (2048 -> 64) on the MXU: bf16 operands, f32 accumulation.
    # Weights arrive pre-cast to bf16; only the activation slab is cast here.
    h = jnp.dot(xh.astype(jnp.bfloat16), w0_ref[0],
                preferred_element_type=jnp.float32)  # (P_pad, 64)

    # --- BatchNorm2d(64), training mode (padded rows of h are exactly zero).
    s1 = jnp.sum(h, axis=0, keepdims=True)
    q1 = jnp.sum(h * h, axis=0, keepdims=True)
    mean1 = s1 * inv_p
    var1 = jnp.maximum(q1 * inv_p - mean1 * mean1, 0.0)
    inv_std1 = jax.lax.rsqrt(var1 + eps)             # (1, 64)

    hh = jnp.maximum(h - mean1, 0.0) * inv_std1

    # --- 1x1 conv (64 -> 3), weight zero-padded to 128 lanes -> unmasked store.
    o_ref[0, 0] = jnp.dot(hh.astype(jnp.bfloat16), w1_ref[0],
                          preferred_element_type=jnp.float32)


def head_forward_batched(push_feats, grasp_feats, params):
    """Run both heads for every rotation through one pallas_call.

    push_feats / grasp_feats: lists (length R) of (N, 2048, Hf, Wf) features.
    Returns (push_outs, grasp_outs): lists of (N, 3, Hf, Wf).
    """
    R = len(push_feats)
    N, C, Hf, Wf = push_feats[0].shape
    Cmid = params["push_w0"].shape[1]                # 64
    Cout = params["push_w1"].shape[1]                # 3
    Cout_pad = 128                                   # lane-dense output
    P = N * Hf * Wf
    P_pad = max(8, ((P + 7) // 8) * 8)               # f32 sublane alignment

    def to_slab(f):
        x = jnp.transpose(f, (0, 2, 3, 1)).reshape(P, C).astype(jnp.float32)
        if P_pad != P:
            x = jnp.pad(x, ((0, P_pad - P), (0, 0)))
        return x

    # (heads=2, rotations=R, P_pad, C) — head is the outer grid axis so the
    # head weights stay resident in VMEM across all R rotation steps.
    slabs = jnp.stack([jnp.stack([to_slab(f) for f in push_feats]),
                       jnp.stack([to_slab(f) for f in grasp_feats])])

    # Pre-cast weights to bf16 once (MXU operands); pad last conv to 128 lanes.
    w0 = jnp.stack([params["push_w0"], params["grasp_w0"]]
                   ).astype(jnp.bfloat16)                        # (2, C, 64)
    w1 = jnp.stack([
        jnp.pad(params["push_w1"], ((0, 0), (0, Cout_pad - Cout))),
        jnp.pad(params["grasp_w1"], ((0, 0), (0, Cout_pad - Cout))),
    ]).astype(jnp.bfloat16)                                      # (2, 64, 128)

    kernel = functools.partial(_head_kernel, p_true=P)

    flops = int(2 * R * 2 * (P_pad * C * Cmid + P_pad * Cmid * Cout_pad))
    bytes_accessed = int(2 * R * (P_pad * C + P_pad * Cout_pad) * 4
                         + 2 * (C * Cmid + Cmid * Cout_pad) * 2)

    out = pl.pallas_call(
        kernel,
        out_shape=jax.ShapeDtypeStruct((2, R, P_pad, Cout_pad), jnp.float32),
        grid=(2, R),
        in_specs=[
            pl.BlockSpec((1, 1, P_pad, C), lambda h, r: (h, r, 0, 0)),
            pl.BlockSpec((1, C, Cmid), lambda h, r: (h, 0, 0)),
            pl.BlockSpec((1, Cmid, Cout_pad), lambda h, r: (h, 0, 0)),
        ],
        out_specs=pl.BlockSpec((1, 1, P_pad, Cout_pad), lambda h, r: (h, r, 0, 0)),
        compiler_params=pltpu.CompilerParams(
            dimension_semantics=("parallel", "parallel"),
        ),
        cost_estimate=pl.CostEstimate(
            flops=flops,
            transcendentals=int(2 * R * (C + Cmid)),
            bytes_accessed=bytes_accessed,
        ),
    )(slabs, w0, w1)

    def from_slab(o):                                # (P_pad, 128) -> NCHW
        o = o[:P, :Cout].reshape(N, Hf, Wf, Cout)
        return jnp.transpose(o, (0, 3, 1, 2))

    push_outs = [from_slab(out[0, r]) for r in range(R)]
    grasp_outs = [from_slab(out[1, r]) for r in range(R)]
    return push_outs, grasp_outs


# -----------------------------------------------------------------------------
# Plain-JAX glue: rotation (affine_grid + grid_sample nearest), upsample,
# and the trunk stub.
# -----------------------------------------------------------------------------
def affine_rotate_nearest(x, theta_mat):
    """F.grid_sample(x, F.affine_grid(theta, x.size()), mode='nearest'),
    align_corners=True semantics, padding_mode='zeros'. x: (N, C, H, W)."""
    N, C, H, W = x.shape
    xs = jnp.linspace(-1.0, 1.0, W) if W > 1 else jnp.array([-1.0])
    ys = jnp.linspace(-1.0, 1.0, H) if H > 1 else jnp.array([-1.0])
    gx, gy = jnp.meshgrid(xs, ys)  # (H, W)
    src_x = theta_mat[0, 0] * gx + theta_mat[0, 1] * gy + theta_mat[0, 2]
    src_y = theta_mat[1, 0] * gx + theta_mat[1, 1] * gy + theta_mat[1, 2]
    jx = jnp.floor((src_x + 1.0) * 0.5 * (W - 1) + 0.5).astype(jnp.int32)
    iy = jnp.floor((src_y + 1.0) * 0.5 * (H - 1) + 0.5).astype(jnp.int32)
    valid = (jx >= 0) & (jx < W) & (iy >= 0) & (iy < H)
    jxc = jnp.clip(jx, 0, W - 1)
    iyc = jnp.clip(iy, 0, H - 1)
    out = x[:, :, iyc, jxc]  # (N, C, H, W)
    return jnp.where(valid[None, None, :, :], out, 0.0)


def upsample_bilinear(x, scale):
    """nn.Upsample(scale_factor=scale, mode='bilinear') with align_corners=True
    (PyTorch-0.3-era semantics). x: (N, C, H, W)."""
    N, C, H, W = x.shape
    Ho, Wo = H * scale, W * scale

    def coords(n_in, n_out):
        if n_in == 1:
            return jnp.zeros((n_out,), jnp.float32)
        return jnp.arange(n_out, dtype=jnp.float32) * (n_in - 1) / (n_out - 1)

    ys, xs = coords(H, Ho), coords(W, Wo)
    y0 = jnp.floor(ys).astype(jnp.int32)
    y1 = jnp.minimum(y0 + 1, H - 1)
    wy = (ys - y0)[None, None, :, None]
    x0 = jnp.floor(xs).astype(jnp.int32)
    x1 = jnp.minimum(x0 + 1, W - 1)
    wx = (xs - x0)[None, None, None, :]

    v00 = x[:, :, y0][:, :, :, x0]
    v01 = x[:, :, y0][:, :, :, x1]
    v10 = x[:, :, y1][:, :, :, x0]
    v11 = x[:, :, y1][:, :, :, x1]
    return (v00 * (1 - wy) * (1 - wx) + v01 * (1 - wy) * wx
            + v10 * wy * (1 - wx) + v11 * wy * wx)


def trunk_stub(x, proj):
    """Deterministic stand-in for densenet121.features: (N,3,H,W) -> (N,1024,H/32,W/32)."""
    # TODO(synk): real pretrained DenseNet-121 features are not reproducible here.
    N, C, H, W = x.shape
    Hf, Wf = H // 32, W // 32
    pooled = x.reshape(N, C, Hf, 32, Wf, 32).mean(axis=(3, 5))  # (N, 3, Hf, Wf)
    feat = jnp.einsum("nchw,ck->nkhw", pooled, proj)            # (N, 1024, Hf, Wf)
    return jax.nn.relu(feat)


# -----------------------------------------------------------------------------
# Parameter init (deterministic, mirrors the module's __init__ for the heads)
# -----------------------------------------------------------------------------
def init_params(key):
    ks = jax.random.split(key, 8)
    trunk_c = 1024

    def kaiming_conv_t(k, cin, cout):
        # nn.init.kaiming_normal on (cout, cin, 1, 1): std = sqrt(2 / fan_in);
        # stored transposed as (cin, cout) so the 1x1 conv is x @ W.
        std = math.sqrt(2.0 / cin)
        return jax.random.normal(k, (cin, cout), dtype=jnp.float32) * std

    params = {
        # trunk-stub projections (deterministic stand-ins, see TODO above)
        "push_color_proj": jax.random.normal(ks[0], (3, trunk_c), jnp.float32) * 0.1,
        "push_depth_proj": jax.random.normal(ks[1], (3, trunk_c), jnp.float32) * 0.1,
        "grasp_color_proj": jax.random.normal(ks[2], (3, trunk_c), jnp.float32) * 0.1,
        "grasp_depth_proj": jax.random.normal(ks[3], (3, trunk_c), jnp.float32) * 0.1,
        # head weights (BatchNorm gamma=1 / beta=0 handled inside the kernel)
        "push_w0": kaiming_conv_t(ks[4], 2048, 64),
        "push_w1": kaiming_conv_t(ks[5], 64, 3),
        "grasp_w0": kaiming_conv_t(ks[6], 2048, 64),
        "grasp_w1": kaiming_conv_t(ks[7], 64, 3),
    }
    return params


# -----------------------------------------------------------------------------
# Full forward. Both branches (is_volatile True/False) feed every
# (head, rotation) feature slab through the single batched Pallas call.
# The whole thing is jitted (static branch flags) so rotation glue fuses into
# one XLA program around the single Pallas dispatch.
# -----------------------------------------------------------------------------
NUM_ROTATIONS = 16


@functools.partial(jax.jit, static_argnames=("is_volatile", "specific_rotation"))
def reactive_net_forward(params, input_color_data, input_depth_data,
                         is_volatile=False, specific_rotation=-1):
    rotations = (list(range(NUM_ROTATIONS)) if is_volatile
                 else [int(specific_rotation)])

    push_feats, grasp_feats, m_afters = [], [], []
    for rotate_idx in rotations:
        t = np.radians(rotate_idx * (360.0 / NUM_ROTATIONS))
        m_before = jnp.array(
            [[np.cos(-t), np.sin(-t), 0.0], [-np.sin(-t), np.cos(-t), 0.0]],
            dtype=jnp.float32)
        m_after = jnp.array(
            [[np.cos(t), np.sin(t), 0.0], [-np.sin(t), np.cos(t), 0.0]],
            dtype=jnp.float32)

        rotate_color = affine_rotate_nearest(input_color_data, m_before)
        rotate_depth = affine_rotate_nearest(input_depth_data, m_before)

        push_feats.append(jnp.concatenate(
            [trunk_stub(rotate_color, params["push_color_proj"]),
             trunk_stub(rotate_depth, params["push_depth_proj"])], axis=1))
        grasp_feats.append(jnp.concatenate(
            [trunk_stub(rotate_color, params["grasp_color_proj"]),
             trunk_stub(rotate_depth, params["grasp_depth_proj"])], axis=1))
        m_afters.append(m_after)

    # One Pallas call covers all heads x rotations (grid = (2, R)).
    push_outs, grasp_outs = head_forward_batched(push_feats, grasp_feats, params)

    output_prob, interm_feat = [], []
    for i in range(len(rotations)):
        push_out = upsample_bilinear(
            affine_rotate_nearest(push_outs[i], m_afters[i]), 16)
        grasp_out = upsample_bilinear(
            affine_rotate_nearest(grasp_outs[i], m_afters[i]), 16)
        output_prob.append([push_out, grasp_out])
        interm_feat.append([push_feats[i], grasp_feats[i]])
    return output_prob, interm_feat


# -----------------------------------------------------------------------------
if __name__ == "__main__":
    key = jax.random.PRNGKey(0)
    k_params, k_color, k_depth = jax.random.split(key, 3)

    params = init_params(k_params)

    # Small NCHW inputs (depth is 3-channel, as in the original pipeline which
    # stacks DDD to feed a 3-channel trunk). H=W=64 -> trunk features 2x2.
    input_color_data = jax.random.normal(k_color, (1, 3, 64, 64), jnp.float32)
    input_depth_data = jax.random.normal(k_depth, (1, 3, 64, 64), jnp.float32)

    # is_volatile=False branch: single rotation, grid = (2 heads, 1 rotation).
    output_prob, interm_feat = reactive_net_forward(
        params, input_color_data, input_depth_data,
        is_volatile=False, specific_rotation=3)

    push_out, grasp_out = output_prob[0]
    push_feat, grasp_feat = interm_feat[0]
    jax.block_until_ready((push_out, grasp_out, push_feat, grasp_feat))

    assert push_out.shape == (1, 3, 32, 32), push_out.shape
    assert grasp_out.shape == (1, 3, 32, 32), grasp_out.shape
    assert push_feat.shape == (1, 2048, 2, 2), push_feat.shape
    assert grasp_feat.shape == (1, 2048, 2, 2), grasp_feat.shape
    assert bool(jnp.all(jnp.isfinite(push_out))) and bool(jnp.all(jnp.isfinite(grasp_out)))

    # is_volatile=True branch: all 16 rotations through one (2, 16) grid.
    output_prob_v, interm_feat_v = reactive_net_forward(
        params, input_color_data, input_depth_data, is_volatile=True)
    jax.block_until_ready(output_prob_v[-1])
    assert len(output_prob_v) == NUM_ROTATIONS
    assert output_prob_v[0][0].shape == (1, 3, 32, 32)
    assert bool(jnp.all(jnp.isfinite(output_prob_v[-1][1])))

    print("KERNEL_OK")
</pallas_src>

<mosaic_0001>
module attributes {stable_mosaic.version = 11 : i64} {
  func.func @_head_kernel(%arg0: i32, %arg1: i32, %arg2: memref<1x1x8x2048xf32, #tpu.memory_space<vmem>>, %arg3: memref<1x2048x64xbf16, #tpu.memory_space<vmem>>, %arg4: memref<1x64x128xbf16, #tpu.memory_space<vmem>>, %arg5: memref<1x1x8x128xf32, #tpu.memory_space<vmem>>) attributes {dimension_semantics = [#tpu.dimension_semantics<parallel>, #tpu.dimension_semantics<parallel>], iteration_bounds = array<i64: 2, 1>, scalar_prefetch = 0 : i64, scratch_operands = 0 : i64, tpu.core_type = #tpu.core_type<tc>, window_params = [{transform_indices = @transform_0, window_bounds = array<i64: 1, 1, 8, 2048>}, {transform_indices = @transform_1, window_bounds = array<i64: 1, 2048, 64>}, {transform_indices = @transform_2, window_bounds = array<i64: 1, 64, 128>}, {transform_indices = @transform_3, window_bounds = array<i64: 1, 1, 8, 128>}]} {
    %c0 = arith.constant 0 : index
    %c0_0 = arith.constant 0 : index
    %c0_1 = arith.constant 0 : index
    %c0_2 = arith.constant 0 : index
    %0 = vector.load %arg2[%c0, %c0_0, %c0_1, %c0_2] : memref<1x1x8x2048xf32, #tpu.memory_space<vmem>>, vector<1x1x8x2048xf32>
    %1 = vector.shape_cast %0 : vector<1x1x8x2048xf32> to vector<8x2048xf32>
    %cst = arith.constant dense<0.000000e+00> : vector<2048xf32>
    %2 = vector.multi_reduction <add>, %1, %cst [0] : vector<8x2048xf32> to vector<2048xf32>
    %3 = vector.shape_cast %2 : vector<2048xf32> to vector<1x2048xf32>
    %4 = arith.mulf %1, %1 : vector<8x2048xf32>
    %cst_3 = arith.constant dense<0.000000e+00> : vector<2048xf32>
    %5 = vector.multi_reduction <add>, %4, %cst_3 [0] : vector<8x2048xf32> to vector<2048xf32>
    %6 = vector.shape_cast %5 : vector<2048xf32> to vector<1x2048xf32>
    %cst_4 = arith.constant 2.500000e-01 : f32
    %7 = vector.broadcast %cst_4 : f32 to vector<1x2048xf32>
    %8 = arith.mulf %3, %7 : vector<1x2048xf32>
    %cst_5 = arith.constant 2.500000e-01 : f32
    %9 = vector.broadcast %cst_5 : f32 to vector<1x2048xf32>
    %10 = arith.mulf %6, %9 : vector<1x2048xf32>
    %11 = arith.mulf %8, %8 : vector<1x2048xf32>
    %12 = arith.subf %10, %11 : vector<1x2048xf32>
    %cst_6 = arith.constant 0.000000e+00 : f32
    %13 = vector.broadcast %cst_6 : f32 to vector<1x2048xf32>
    %14 = arith.maximumf %12, %13 : vector<1x2048xf32>
    %cst_7 = arith.constant 9.99999974E-6 : f32
    %15 = vector.broadcast %cst_7 : f32 to vector<1x2048xf32>
    %16 = arith.addf %14, %15 : vector<1x2048xf32>
    %17 = math.rsqrt %16 : vector<1x2048xf32>
    %18 = vector.broadcast %8 : vector<1x2048xf32> to vector<8x2048xf32>
    %19 = arith.subf %1, %18 : vector<8x2048xf32>
    %cst_8 = arith.constant 0.000000e+00 : f32
    %20 = vector.broadcast %cst_8 : f32 to vector<8x2048xf32>
    %21 = arith.maximumf %19, %20 : vector<8x2048xf32>
    %22 = vector.broadcast %17 : vector<1x2048xf32> to vector<8x2048xf32>
    %23 = arith.mulf %21, %22 : vector<8x2048xf32>
    %24 = tpu.iota {dimensions = array<i32: 0>} : vector<8x1xi32>
    %c4_i32 = arith.constant 4 : i32
    %25 = vector.broadcast %c4_i32 : i32 to vector<8x1xi32>
    %26 = arith.cmpi slt, %24, %25 : vector<8x1xi32>
    %cst_9 = arith.constant 0.000000e+00 : f32
    %27 = vector.shape_cast %26 : vector<8x1xi1> to vector<8x1xi1>
    %28 = vector.broadcast %27 : vector<8x1xi1> to vector<8x2048xi1>
    %29 = vector.broadcast %cst_9 : f32 to vector<8x2048xf32>
    %30 = arith.select %28, %23, %29 : vector<8x2048xi1>, vector<8x2048xf32>
    %31 = arith.truncf %30 : vector<8x2048xf32> to vector<8x2048xbf16>
    %c0_10 = arith.constant 0 : index
    %c0_11 = arith.constant 0 : index
    %c0_12 = arith.constant 0 : index
    %32 = vector.load %arg3[%c0_10, %c0_11, %c0_12] : memref<1x2048x64xbf16, #tpu.memory_space<vmem>>, vector<1x2048x64xbf16>
    %33 = vector.shape_cast %32 : vector<1x2048x64xbf16> to vector<2048x64xbf16>
    %cst_13 = arith.constant dense<0.000000e+00> : vector<8x64xf32>
    %34 = tpu.matmul %31, %33, %cst_13 {dimension_numbers = #tpu.dot_dimension_numbers<[1], [0], [0], [1], [0, 0, 1, 1], [], []>} : vector<8x2048xbf16>, vector<2048x64xbf16>, vector<8x64xf32> -> vector<8x64xf32>
    %cst_14 = arith.constant dense<0.000000e+00> : vector<64xf32>
    %35 = vector.multi_reduction <add>, %34, %cst_14 [0] : vector<8x64xf32> to vector<64xf32>
    %36 = vector.shape_cast %35 : vector<64xf32> to vector<1x64xf32>
    %37 = arith.mulf %34, %34 : vector<8x64xf32>
    %cst_15 = arith.constant dense<0.000000e+00> : vector<64xf32>
    %38 = vector.multi_reduction <add>, %37, %cst_15 [0] : vector<8x64xf32> to vector<64xf32>
    %39 = vector.shape_cast %38 : vector<64xf32> to vector<1x64xf32>
    %cst_16 = arith.constant 2.500000e-01 : f32
    %40 = vector.broadcast %cst_16 : f32 to vector<1x64xf32>
    %41 = arith.mulf %36, %40 : vector<1x64xf32>
    %cst_17 = arith.constant 2.500000e-01 : f32
    %42 = vector.broadcast %cst_17 : f32 to vector<1x64xf32>
    %43 = arith.mulf %39, %42 : vector<1x64xf32>
    %44 = arith.mulf %41, %41 : vector<1x64xf32>
    %45 = arith.subf %43, %44 : vector<1x64xf32>
    %cst_18 = arith.constant 0.000000e+00 : f32
    %46 = vector.broadcast %cst_18 : f32 to vector<1x64xf32>
    %47 = arith.maximumf %45, %46 : vector<1x64xf32>
    %cst_19 = arith.constant 9.99999974E-6 : f32
    %48 = vector.broadcast %cst_19 : f32 to vector<1x64xf32>
    %49 = arith.addf %47, %48 : vector<1x64xf32>
    %50 = math.rsqrt %49 : vector<1x64xf32>
    %51 = vector.broadcast %41 : vector<1x64xf32> to vector<8x64xf32>
    %52 = arith.subf %34, %51 : vector<8x64xf32>
    %cst_20 = arith.constant 0.000000e+00 : f32
    %53 = vector.broadcast %cst_20 : f32 to vector<8x64xf32>
    %54 = arith.maximumf %52, %53 : vector<8x64xf32>
    %55 = vector.broadcast %50 : vector<1x64xf32> to vector<8x64xf32>
    %56 = arith.mulf %54, %55 : vector<8x64xf32>
    %57 = arith.truncf %56 : vector<8x64xf32> to vector<8x64xbf16>
    %c0_21 = arith.constant 0 : index
    %c0_22 = arith.constant 0 : index
    %c0_23 = arith.constant 0 : index
    %58 = vector.load %arg4[%c0_21, %c0_22, %c0_23] : memref<1x64x128xbf16, #tpu.memory_space<vmem>>, vector<1x64x128xbf16>
    %59 = vector.shape_cast %58 : vector<1x64x128xbf16> to vector<64x128xbf16>
    %cst_24 = arith.constant dense<0.000000e+00> : vector<8x128xf32>
    %60 = tpu.matmul %57, %59, %cst_24 {dimension_numbers = #tpu.dot_dimension_numbers<[1], [0], [0], [1], [0, 0, 1, 1], [], []>} : vector<8x64xbf16>, vector<64x128xbf16>, vector<8x128xf32> -> vector<8x128xf32>
    %c0_25 = arith.constant 0 : index
    %c0_26 = arith.constant 0 : index
    %c0_27 = arith.constant 0 : index
    %c0_28 = arith.constant 0 : index
    %61 = vector.load %arg5[%c0_25, %c0_26, %c0_27, %c0_28] : memref<1x1x8x128xf32, #tpu.memory_space<vmem>>, vector<1x1x8x128xf32>
    %62 = vector.shape_cast %61 : vector<1x1x8x128xf32> to vector<8x128xf32>
    %63 = vector.shape_cast %60 : vector<8x128xf32> to vector<1x1x8x128xf32>
    tpu.vector_store %arg5[%c0_25, %c0_26, %c0_27, %c0_28], %63 {strides = array<i32>} : memref<1x1x8x128xf32, #tpu.memory_space<vmem>>, vector<1x1x8x128xf32>,
    return
  }
  func.func @transform_0(%arg0: i32, %arg1: i32) -> (i32, i32, i32, i32) {
    %c0_i32 = arith.constant 0 : i32
    %c0_i32_0 = arith.constant 0 : i32
    %c0_i32_1 = arith.constant 0 : i32
    return %arg0, %arg1, %c0_i32, %c0_i32_0 : i32, i32, i32, i32
  }
  func.func @transform_1(%arg0: i32, %arg1: i32) -> (i32, i32, i32) {
    %c0_i32 = arith.constant 0 : i32
    %c0_i32_0 = arith.constant 0 : i32
    %c0_i32_1 = arith.constant 0 : i32
    return %arg0, %c0_i32, %c0_i32_0 : i32, i32, i32
  }
  func.func @transform_2(%arg0: i32, %arg1: i32) -> (i32, i32, i32) {
    %c0_i32 = arith.constant 0 : i32
    %c0_i32_0 = arith.constant 0 : i32
    %c0_i32_1 = arith.constant 0 : i32
    return %arg0, %c0_i32, %c0_i32_0 : i32, i32, i32
  }
  func.func @transform_3(%arg0: i32, %arg1: i32) -> (i32, i32, i32, i32) {
    %c0_i32 = arith.constant 0 : i32
    %c0_i32_0 = arith.constant 0 : i32
    %c0_i32_1 = arith.constant 0 : i32
    return %arg0, %arg1, %c0_i32, %c0_i32_0 : i32, i32, i32, i32
  }
}

</mosaic_0001>

<bundles_post_ra>
// kernel: reactive_net_forward.1
= control target key start
LH: loop header
LB: loop body
LE: loop exit
PB: predicated region body
PF: predicated region fallthrough
CT: control target
= control target key end

     0   :  { %s2845_s12 = smov 0   ;;  %s2847_s13 = smov 0   ;;  %s3242_s0 = inlined_call_operand.vmem [shape: f32[2,1,8,2048], index: 0, kind: input, shape index: {}]   ;;  %s3243_s1 = inlined_call_operand.vmem [shape: bf16[2,2048,64], index: 1, kind: input, shape index: {}]   ;;  %s3244_s2 = inlined_call_operand.vmem [shape: bf16[2,64,128], index: 2, kind: input, shape index: {}]   ;;  %s3245_s3 = inlined_call_operand.vmem [shape: f32[2,1,8,128], index: 3, kind: output, shape index: {}]  }
   0x1   :  { %s2849_s14 = smov 0  }
   0x2 LB: > { %s25_s15 = sadd.s32 1, %s2817_s13  ;;  %p2220_p0 = scmp.ge.s32.totalorder %s2821_s14, 1  ;;  %s2821_s14 = sphi %s2849_s14, %s13_s14   ;;  %s2817_s13 = sphi %s2847_s13, %s3249_s13   ;;  %s2813_s12 = sphi %s2845_s12, %s3248_s12  }
   0x3   : > { %p27_p1 = scmp.ge.s32.totalorder %s25_s15, 2  ;;  %p177_p2 = scmp.lt.s32.totalorder %s2821_s14, 3 }
   0x5   : > { %s3251_s15 = smov (%p27_p1, %s25_s15), 0  ;;  %p178_p3 = pnand %p2220_p0, %p177_p2 }
   0x6   : > { %p217_p4 = scmp.lt.s32.totalorder (!%p178_p3), %s2813_s12, 1 }
   0x7   : > { %181 = sbr.rel (%p178_p3) target bundleno = 614 (0x266), region = 32 }
   0xc   : > { %s3253_s12 = smov (!%p217_p4, %s2813_s12), 1  ;;  %vm2824_vm2 = vmmov 0   ;;  %vm2009_vm3 = vcmask 523264  }
   0xd   : > { %s2412_s16 = sshll.u32 %s3253_s12, 10  ;;  %s2411_s20 = sshll.u32 %s3253_s12, 7 }
   0xe   : > { %s2869_s19 = scalar_lea.vmem %s3243_s1, %s2412_s16  ;;  %s2905_s23 = scalar_lea.vmem %s3242_s0, %s2411_s20 }
   0xf   : > { %v2633_v0 = vld [vmem:[%s2869_s19 + $0x78] sm:$0xff]   ;;  %v2637_v4 = vld [vmem:[%s2869_s19 + $0x70] sm:$0xff]   ;;  %v2641_v8 = vld [vmem:[%s2869_s19 + $0x68] sm:$0xff]   ;;  %s2413_s24 = sshll.u32 %s3253_s12, 5  ;;  %s2227_s28 = sshll.u32 %s3253_s12, 3 }
  0x10   : > { %v2634_v1 = vld [vmem:[%s2869_s19 + $0xf8] sm:$0xff]   ;;  %2414 = vmatprep.subr.bf16.mxu0 %v2633_v0  ;;  %v2638_v5 = vld [vmem:[%s2869_s19 + $0xf0] sm:$0xff]   ;;  %v2642_v9 = vld [vmem:[%s2869_s19 + $0xe8] sm:$0xff]   ;;  %s235_s27 = scalar_lea.vmem %s3244_s2, %s2413_s24  ;;  %s242_s4 = scalar_lea.vmem %s3245_s3, %s2227_s28 }
  0x11   : > { %v2635_v2 = vld [vmem:[%s2869_s19 + $0x38] sm:$0xff]   ;;  %2436 = vmatprep.subr.bf16.mxu1 %v2634_v1  ;;  %v2639_v6 = vld [vmem:[%s2869_s19 + $0x30] sm:$0xff]   ;;  %v2643_v10 = vld [vmem:[%s2869_s19 + $0x28] sm:$0xff]  }
  0x12   : > { %v2636_v3 = vld [vmem:[%s2869_s19 + $0xb8] sm:$0xff]   ;;  %2415 = vmatpush3.bf16.msra.mxu0 %v2635_v2  ;;  %v2640_v7 = vld [vmem:[%s2869_s19 + $0xb0] sm:$0xff]   ;;  %v2644_v11 = vld [vmem:[%s2869_s19 + $0xa8] sm:$0xff]  }
  0x13   : > { %2437 = vmatpush3.bf16.msra.mxu1 %v2636_v3  ;;  %2416 = vmatprep.subr.bf16.mxu0 %v2637_v4  ;;  %v2645_v12 = vld [vmem:[%s2869_s19 + $0x60] sm:$0xff]   ;;  %v2649_v16 = vld [vmem:[%s2869_s19 + $0x58] sm:$0xff]   ;;  %v2653_v20 = vld [vmem:[%s2869_s19 + $0x50] sm:$0xff]  }
  0x14   : > { %2438 = vmatprep.subr.bf16.mxu1 %v2638_v5  ;;  %v2646_v13 = vld [vmem:[%s2869_s19 + $0xe0] sm:$0xff]   ;;  %v2650_v17 = vld [vmem:[%s2869_s19 + $0xd8] sm:$0xff]   ;;  %v2654_v21 = vld [vmem:[%s2869_s19 + $0xd0] sm:$0xff]  }
  0x15   : > { %v2647_v14 = vld [vmem:[%s2869_s19 + $0x20] sm:$0xff]   ;;  %v2651_v18 = vld [vmem:[%s2869_s19 + $0x18] sm:$0xff]   ;;  %v2655_v22 = vld [vmem:[%s2869_s19 + $0x10] sm:$0xff]  }
  0x16   : > { %2417 = vmatpush3.bf16.msra.mxu0 %v2639_v6  ;;  %v2648_v15 = vld [vmem:[%s2869_s19 + $0xa0] sm:$0xff]   ;;  %v2652_v19 = vld [vmem:[%s2869_s19 + $0x98] sm:$0xff]   ;;  %v2656_v23 = vld [vmem:[%s2869_s19 + $0x90] sm:$0xff]  }
  0x17   : > { %2439 = vmatpush3.bf16.msra.mxu1 %v2640_v7  ;;  %2418 = vmatprep.subr.bf16.mxu0 %v2641_v8  ;;  %v2657_v24 = vld [vmem:[%s2869_s19 + $0x48] sm:$0xff]   ;;  %v2661_v28 = vld [vmem:[%s2869_s19 + $0x40] sm:$0xff]   ;;  %v2913_v33 = vld [vmem:[%s2905_s23 + $0x18] sm:$0xff] }
  0x18   : > { %2440 = vmatprep.subr.bf16.mxu1 %v2642_v9  ;;  %v2658_v25 = vld [vmem:[%s2869_s19 + $0xc8] sm:$0xff]   ;;  %v2662_v29 = vld [vmem:[%s2869_s19 + $0xc0] sm:$0xff]   ;;  %v278_v36 = vrot.slane %v2913_v33, 4  ;;  %v359_v37 = vmul.f32 %v2913_v33, %v2913_v33  ;;  %v2665_v38 = vld [vmem:[%s2869_s19 + $0x178] sm:$0xff]  }
  0x19   : > { %v2659_v26 = vld [vmem:[%s2869_s19 + $0x8] sm:$0xff]   ;;  %v2663_v30 = vld [vmem:[%s2869_s19] sm:$0xff]   ;;  %v2666_v39 = vld [vmem:[%s2869_s19 + $0x1f8] sm:$0xff]  }
  0x1a   : > { %2419 = vmatpush3.bf16.msra.mxu0 %v2643_v10  ;;  %v2660_v27 = vld [vmem:[%s2869_s19 + $0x88] sm:$0xff]   ;;  %v2664_v31 = vld [vmem:[%s2869_s19 + $0x80] sm:$0xff]   ;;  %v279_v43 = vadd.f32 %v278_v36, %v2913_v33  ;;  %v390_v44 = vrot.slane %v359_v37, 4  ;;  %v2929_v45 = vld [vmem:[%s2905_s23 + $0x10] sm:$0xff] }
  0x1b   : > { %2441 = vmatpush3.bf16.msra.mxu1 %v2644_v11  ;;  %2420 = vmatprep.subr.bf16.mxu0 %v2645_v12  ;;  %v2910_v32 = vld [vmem:[%s2905_s23 + $0x8] sm:$0xff]  ;;  %v2924_v40 = vld [vmem:[%s2905_s23] sm:$0xff]  ;;  %v272_v48 = vrot.slane %v2929_v45, 4  ;;  %v358_v49 = vmul.f32 %v2929_v45, %v2929_v45 }
  0x1c   : > { %2442 = vmatprep.subr.bf16.mxu1 %v2646_v13  ;;  %v266_v34 = vrot.slane %v2910_v32, 4  ;;  %v357_v35 = vmul.f32 %v2910_v32, %v2910_v32  ;;  %v260_v46 = vrot.slane %v2924_v40, 4  ;;  %v356_v47 = vmul.f32 %v2924_v40, %v2924_v40 }
  0x1d   : > { %v280_v52 = vrot.slane %v279_v43, 2  ;;  %v391_v53 = vadd.f32 %v390_v44, %v359_v37  ;;  %v273_v56 = vadd.f32 %v272_v48, %v2929_v45  ;;  %v384_v57 = vrot.slane %v358_v49, 4 }
  0x1e   : > { %2421 = vmatpush3.bf16.msra.mxu0 %v2647_v14  ;;  %v267_v41 = vadd.f32 %v266_v34, %v2910_v32  ;;  %v378_v42 = vrot.slane %v357_v35, 4  ;;  %v261_v54 = vadd.f32 %v260_v46, %v2924_v40  ;;  %v372_v55 = vrot.slane %v356_v47, 4 }
  0x1f   : > { %2443 = vmatpush3.bf16.msra.mxu1 %v2648_v15  ;;  %2422 = vmatprep.subr.bf16.mxu0 %v2649_v16  ;;  %v281_v60 = vadd.f32 %v280_v52, %v279_v43  ;;  %v392_v61 = vrot.slane %v391_v53, 2  ;;  %v274_v0 = vrot.slane %v273_v56, 2  ;;  %v385_v1 = vadd.f32 %v384_v57, %v358_v49 }
  0x20   : > { %2444 = vmatprep.subr.bf16.mxu1 %v2650_v17  ;;  %v268_v50 = vrot.slane %v267_v41, 2  ;;  %v379_v51 = vadd.f32 %v378_v42, %v357_v35  ;;  %v262_v62 = vrot.slane %v261_v54, 2  ;;  %v373_v63 = vadd.f32 %v372_v55, %v356_v47 }
  0x21   : > { %v282_v4 = vrot.slane %v281_v60, 1  ;;  %v393_v5 = vadd.f32 %v392_v61, %v391_v53  ;;  %v275_v8 = vadd.f32 %v274_v0, %v273_v56  ;;  %v386_v9 = vrot.slane %v385_v1, 2 }
  0x22   : > { %2423 = vmatpush3.bf16.msra.mxu0 %v2651_v18  ;;  %v269_v58 = vadd.f32 %v268_v50, %v267_v41  ;;  %v380_v59 = vrot.slane %v379_v51, 2  ;;  %v263_v6 = vadd.f32 %v262_v62, %v261_v54  ;;  %v374_v7 = vrot.slane %v373_v63, 2 }
  0x23   : > { %2445 = vmatpush3.bf16.msra.mxu1 %v2652_v19  ;;  %2424 = vmatprep.subr.bf16.mxu0 %v2653_v20  ;;  %v283_v12 = vadd.f32 %v282_v4, %v281_v60  ;;  %v394_v13 = vrot.slane %v393_v5, 1  ;;  %v276_v16 = vrot.slane %v275_v8, 1  ;;  %v387_v17 = vadd.f32 %v386_v9, %v385_v1  ;;  %v2954_v4 = vld [vmem:[%s2905_s23 + $0x38] sm:$0xff] }
  0x24   : > { %2446 = vmatprep.subr.bf16.mxu1 %v2654_v21  ;;  %v270_v2 = vrot.slane %v269_v58, 1  ;;  %v381_v3 = vadd.f32 %v380_v59, %v379_v51  ;;  %v264_v14 = vrot.slane %v263_v6, 1  ;;  %v375_v15 = vadd.f32 %v374_v7, %v373_v63 }
  0x25   : > { %v395_v20 = vadd.f32 %v394_v13, %v393_v5  ;;  %v471_v21 = vmul.f32 0.25, %v283_v12  ;;  %v628_v54 = vlaneseq  ;;  %v2957_v5 = vld [vmem:[%s2905_s23 + $0x20] sm:$0xff]  ;;  %v302_v9 = vrot.slane %v2954_v4, 4 }
  0x26   : > { %2425 = vmatpush3.bf16.msra.mxu0 %v2655_v22  ;;  %v271_v10 = vadd.f32 %v270_v2, %v269_v58  ;;  %v382_v11 = vrot.slane %v381_v3, 1  ;;  %v265_v22 = vadd.f32 %v264_v14, %v263_v6 }
  0x27   : > { %2447 = vmatpush3.bf16.msra.mxu1 %v2656_v23  ;;  %2426 = vmatprep.subr.bf16.mxu0 %v2657_v24  ;;  %v376_v23 = vrot.slane %v375_v15, 1  ;;  %v277_v24 = vadd.f32 %v276_v16, %v275_v8  ;;  %v583_v56 = vsub.f32 %v2913_v33, %v471_v21  ;;  %v629_v57 = vshrl.u32 %v628_v54, 7  ;;  %v2667_v8 = vld [vmem:[%s2869_s19 + $0x138] sm:$0xff]  }
  0x28   : > { %2448 = vmatprep.subr.bf16.mxu1 %v2658_v25  ;;  %v383_v18 = vadd.f32 %v382_v11, %v381_v3  ;;  %v469_v19 = vmul.f32 0.25, %v271_v10  ;;  %v388_v25 = vrot.slane %v387_v17, 1  ;;  %v2944_v3 = vld [vmem:[%s2905_s23 + $0x28] sm:$0xff]  ;;  %v363_v10 = vmul.f32 %v2954_v4, %v2954_v4 }
  0x29   : > { %v470_v36 = vmul.f32 0.25, %v277_v24  ;;  %v599_v61 = vmax.f32 %v583_v56, 0.0  ;;  %vm630_vm0 = vcmp.lt.s32.totalorder %v629_v57, 4  ;;  %v284_v11 = vrot.slane %v2957_v5, 4  ;;  %v2669_v24 = vld [vmem:[%s2869_s19 + $0x170] sm:$0xff]  }
  0x2a   : > { %2427 = vmatpush3.bf16.msra.mxu0 %v2659_v26  ;;  %v485_v26 = vmul.f32 0.25, %v383_v18  ;;  %v389_v35 = vadd.f32 %v388_v25, %v387_v17  ;;  %v581_v55 = vsub.f32 %v2910_v32, %v469_v19  ;;  %vm2946_vm1 = vmpackc.low %vm630_vm0, %vm630_vm0 }
  0x2b   : > { %2449 = vmatpush3.bf16.msra.mxu1 %v2660_v27  ;;  %2428 = vmatprep.subr.bf16.mxu0 %v2661_v28  ;;  %v501_v27 = vmul.f32 %v469_v19, %v469_v19  ;;  %v487_v28 = vmul.f32 0.25, %v395_v20  ;;  %v502_v43 = vmul.f32 %v470_v36, %v470_v36  ;;  %v582_v60 = vsub.f32 %v2929_v45, %v470_v36  ;;  %v2672_v36 = vld [vmem:[%s2869_s19 + $0x1b0] sm:$0xff]  }
  0x2c   : > { %2450 = vmatprep.subr.bf16.mxu1 %v2662_v29  ;;  %v503_v29 = vmul.f32 %v471_v21, %v471_v21  ;;  %v486_v42 = vmul.f32 0.25, %v389_v35  ;;  %v597_v59 = vmax.f32 %v581_v55, 0.0  ;;  %v361_v45 = vmul.f32 %v2944_v3, %v2944_v3 }
  0x2d   : > { %v517_v34 = vsub.f32 %v485_v26, %v501_v27  ;;  %v598_v2 = vmax.f32 %v582_v60, 0.0  ;;  %v303_v19 = vadd.f32 %v302_v9, %v2954_v4  ;;  %v414_v20 = vrot.slane %v363_v10, 4  ;;  %v2679_v9 = vld [vmem:[%s2869_s19 + $0x120] sm:$0xff]  }
  0x2e   : > { %2429 = vmatpush3.bf16.msra.mxu0 %v2663_v30  ;;  %v377_v30 = vadd.f32 %v376_v23, %v375_v15  ;;  %v519_v37 = vsub.f32 %v487_v28, %v503_v29  ;;  %v518_v48 = vsub.f32 %v486_v42, %v502_v43  ;;  %v2668_v15 = vld [vmem:[%s2869_s19 + $0x1b8] sm:$0xff]   ;;  %v402_v17 = vrot.slane %v361_v45, 4  ;;  %v2670_v29 = vld [vmem:[%s2869_s19 + $0x1f0] sm:$0xff]   ;;  %v2673_v42 = vld [vmem:[%s2869_s19 + $0x168] sm:$0xff]  }
  0x2f   : > { %2451 = vmatpush3.bf16.msra.mxu1 %v2664_v31  ;;  %2458 = vmatprep.subr.bf16.mxu0 %v2665_v38  ;;  %v468_v31 = vmul.f32 0.25, %v265_v22  ;;  %v533_v41 = vmax.f32 %v517_v34, 0.0  ;;  %v285_v21 = vadd.f32 %v284_v11, %v2957_v5  ;;  %v2971_v22 = vld [vmem:[%s2905_s23 + $0x30] sm:$0xff]  ;;  %v360_v27 = vmul.f32 %v2957_v5, %v2957_v5 }
  0x30   : > { %2480 = vmatprep.subr.bf16.mxu1 %v2666_v39  ;;  %v484_v38 = vmul.f32 0.25, %v377_v30  ;;  %v535_v44 = vmax.f32 %v519_v37, 0.0  ;;  %v534_v51 = vmax.f32 %v518_v48, 0.0  ;;  %v403_v26 = vadd.f32 %v402_v17, %v361_v45  ;;  %v2671_v30 = vld [vmem:[%s2869_s19 + $0x130] sm:$0xff]   ;;  %v2674_v48 = vld [vmem:[%s2869_s19 + $0x1e8] sm:$0xff]  }
  0x31   : > { %v500_v39 = vmul.f32 %v468_v31, %v468_v31  ;;  %v549_v47 = vadd.f32 1e-05, %v533_v41  ;;  %v580_v58 = vsub.f32 %v2924_v40, %v468_v31  ;;  %v290_v40 = vrot.slane %v2944_v3, 4 }
  0x32   : > { %v551_v49 = vadd.f32 1e-05, %v535_v44  ;;  %v550_v53 = vadd.f32 1e-05, %v534_v51  ;;  %v304_v31 = vrot.slane %v303_v19, 2  ;;  %v415_v34 = vadd.f32 %v414_v20, %v363_v10 }
  0x33   : > { %v516_v46 = vsub.f32 %v484_v38, %v500_v39  ;;  %2765 = vrsqrt.f32 %v549_v47  ;;  %v596_v63 = vmax.f32 %v580_v58, 0.0  ;;  %v291_v16 = vadd.f32 %v290_v40, %v2944_v3  ;;  %v2676_v58 = vld [vmem:[%s2869_s19 + $0x1a8] sm:$0xff]   ;;  %v2678_v40 = vld [vmem:[%s2869_s19 + $0x1e0] sm:$0xff]  }
  0x34   : > { %2767 = vrsqrt.f32 %v551_v49  ;;  %v286_v35 = vrot.slane %v285_v21, 2  ;;  %v404_v38 = vrot.slane %v403_v26, 2  ;;  %v396_v39 = vrot.slane %v360_v27, 4 }
  0x35   : > { %v532_v50 = vmax.f32 %v516_v46, 0.0  ;;  %v292_v25 = vrot.slane %v291_v16, 2  ;;  %v296_v41 = vrot.slane %v2971_v22, 4  ;;  %v305_v43 = vadd.f32 %v304_v31, %v303_v19  ;;  %v2685_v31 = vld [vmem:[%s2869_s19 + $0x150] sm:$0xff]  }
  0x36   : > { %v416_v44 = vrot.slane %v415_v34, 2  ;;  %v287_v46 = vadd.f32 %v286_v35, %v285_v21  ;;  %v362_v47 = vmul.f32 %v2971_v22, %v2971_v22  ;;  %v397_v51 = vadd.f32 %v396_v39, %v360_v27  ;;  %v2682_v21 = vld [vmem:[%s2869_s19 + $0x1d8] sm:$0xff]  }
  0x37   : > { %v548_v52 = vadd.f32 1e-05, %v532_v50  ;;  %v293_v37 = vadd.f32 %v292_v25, %v291_v16  ;;  %v405_v50 = vadd.f32 %v404_v38, %v403_v26  ;;  %v306_v54 = vrot.slane %v305_v43, 1  ;;  %v2683_v26 = vld [vmem:[%s2869_s19 + $0x118] sm:$0xff]  }
  0x38   : > { %v417_v55 = vadd.f32 %v416_v44, %v415_v34  ;;  %v288_v56 = vrot.slane %v287_v46, 1  ;;  %v408_v57 = vrot.slane %v362_v47, 4 }
  0x39   : > { %2769 = vrsqrt.f32 %v548_v52  ;;  %v294_v49 = vrot.slane %v293_v37, 1  ;;  %v297_v52 = vadd.f32 %v296_v41, %v2971_v22  ;;  %v406_v60 = vrot.slane %v405_v50, 1 }
  0x3a   : > { %2771 = vrsqrt.f32 %v550_v53  ;;  %v2675_v53 = vld [vmem:[%s2869_s19 + $0x128] sm:$0xff]  }
  0x3b   : > { %v407_v45 = vadd.f32 %v406_v60, %v405_v50 }
  0x40   : > { %v2766_v62 = vpop.eup %2765 }
  0x41   : > { %v2768_v0 = vpop.eup %2767  ;;  %v613_v1 = vmul.f32 %v2766_v62, %v597_v59  ;;  %v295_v59 = vadd.f32 %v294_v49, %v293_v37  ;;  %v298_v62 = vrot.slane %v297_v52, 2  ;;  %v2688_v49 = vld [vmem:[%s2869_s19 + $0x190] sm:$0xff]  }
  0x42   : > { %v615_v33 = vmul.f32 %v2768_v0, %v599_v61  ;;  %v398_v61 = vrot.slane %v397_v51, 2  ;;  %v307_v0 = vadd.f32 %v306_v54, %v305_v43 }
  0x43   : > { %v2357_v7 = vpack.c.bf16 %v613_v1, %v613_v1  ;;  %v418_v1 = vrot.slane %v417_v55, 1 }
  0x44   : > { %v2363_v13 = vpack.c.bf16 %v615_v33, %v615_v33  ;;  %v409_v33 = vadd.f32 %v408_v57, %v362_v47  ;;  %v2998_v11 = vmul.f32 0.25, %v307_v0  ;;  %v2687_v47 = vld [vmem:[%s2869_s19 + $0x110] sm:$0xff]   ;;  %v2692_v57 = vld [vmem:[%s2869_s19 + $0x188] sm:$0xff]  }
  0x45   : > { %2358 = vmatprep.mubr.msk.bf16.mxu0 %vm2946_vm1, %v2357_v7  ;;  %v399_v7 = vadd.f32 %v398_v61, %v397_v51  ;;  %v419_v10 = vadd.f32 %v418_v1, %v417_v55  ;;  %v2691_v55 = vld [vmem:[%s2869_s19 + $0x108] sm:$0xff]   ;;  %v2694_v61 = vld [vmem:[%s2869_s19 + $0x1c0] sm:$0xff]  }
  0x46   : > { %v2770_v6 = vpop.eup %2769  ;;  %2364 = vmatprep.mubr.msk.bf16.mxu1 %vm2946_vm1, %v2363_v13  ;;  %v410_v13 = vrot.slane %v409_v33, 2  ;;  %v507_v20 = vmul.f32 %v2998_v11, %v2998_v11  ;;  %v2696_v1 = vld [vmem:[%s2869_s19 + $0x180] sm:$0xff]  }
  0x47   : > { %v2772_v12 = vpop.eup %2771  ;;  %v612_v14 = vmul.f32 %v2770_v6, %v596_v63  ;;  %v2677_v63 = vld [vmem:[%s2869_s19 + $0x160] sm:$0xff]   ;;  %v2995_v6 = vmul.f32 0.25, %v295_v59  ;;  %v400_v17 = vrot.slane %v399_v7, 1  ;;  %v491_v19 = vmul.f32 0.25, %v419_v10  ;;  %v3035_v10 = vld [vmem:[%s2905_s23 + $0x48] sm:$0xff] }
  0x48   : > { %v614_v18 = vmul.f32 %v2772_v12, %v598_v2  ;;  %v289_v2 = vadd.f32 %v288_v56, %v287_v46  ;;  %v2693_v59 = vld [vmem:[%s2869_s19 + $0x140] sm:$0xff]  }
  0x49   : > { %v2360_v23 = vpack.c.bf16 %v612_v14, %v612_v14  ;;  %v2680_v14 = vld [vmem:[%s2869_s19 + $0x1a0] sm:$0xff]   ;;  %v505_v16 = vmul.f32 %v2995_v6, %v2995_v6  ;;  %v523_v27 = vsub.f32 %v491_v19, %v507_v20  ;;  %v585_v60 = vsub.f32 %v2944_v3, %v2995_v6  ;;  %v2698_v6 = vld [vmem:[%s2869_s19 + $0x2f8] sm:$0xff]  }
  0x4a   : > { %v2366_v28 = vpack.c.bf16 %v614_v18, %v614_v18  ;;  %v3000_v12 = vmul.f32 0.25, %v289_v2  ;;  %v2681_v18 = vld [vmem:[%s2869_s19 + $0x158] sm:$0xff]  }
  0x4b   : > { %2361 = vmatmul.mubr.msk.bf16.vlgmr.msra.gmra.mxu0 %vm2946_vm1, %v2360_v23  ;;  %v601_v2 = vmax.f32 %v585_v60, 0.0 }
  0x4c   : > { %2367 = vmatmul.mubr.msk.bf16.vlgmr.msra.gmra.mxu1 %vm2946_vm1, %v2366_v28  ;;  %2459 = vmatpush3.bf16.msra.mxu0 %v2667_v8  ;;  %v299_v8 = vadd.f32 %v298_v62, %v297_v52  ;;  %v504_v25 = vmul.f32 %v3000_v12, %v3000_v12  ;;  %v2689_v52 = vld [vmem:[%s2869_s19 + $0x148] sm:$0xff]   ;;  %v2695_v62 = vld [vmem:[%s2869_s19 + $0x100] sm:$0xff]  }
  0x4d   : > { %2481 = vmatpush3.bf16.msra.mxu1 %v2668_v15  ;;  %2460 = vmatprep.subr.bf16.mxu0 %v2669_v24  ;;  %v489_v15 = vmul.f32 0.25, %v407_v45  ;;  %v401_v24 = vadd.f32 %v400_v17, %v399_v7 }
  0x4e   : > { %2482 = vmatprep.subr.bf16.mxu1 %v2670_v29  ;;  %v300_v28 = vrot.slane %v299_v8, 1  ;;  %v411_v29 = vadd.f32 %v410_v13, %v409_v33  ;;  %v584_v33 = vsub.f32 %v2957_v5, %v3000_v12  ;;  %v314_v12 = vrot.slane %v3035_v10, 4  ;;  %v3041_v13 = vld [vmem:[%s2905_s23 + $0x58] sm:$0xff] }
  0x4f   : > { %v521_v23 = vsub.f32 %v489_v15, %v505_v16  ;;  %v488_v35 = vmul.f32 0.25, %v401_v24  ;;  %v3047_v15 = vld [vmem:[%s2905_s23 + $0x50] sm:$0xff]  ;;  %v326_v17 = vrot.slane %v3041_v13, 4 }
  0x50   : > { %2461 = vmatpush3.bf16.msra.mxu0 %v2671_v30  ;;  %v2684_v30 = vld [vmem:[%s2869_s19 + $0x198] sm:$0xff]   ;;  %v301_v37 = vadd.f32 %v300_v28, %v299_v8  ;;  %v412_v38 = vrot.slane %v411_v29, 1 }
  0x51   : > { %2483 = vmatpush3.bf16.msra.mxu1 %v2672_v36  ;;  %2462 = vmatprep.subr.bf16.mxu0 %v2673_v42  ;;  %v537_v34 = vmax.f32 %v521_v23, 0.0  ;;  %v539_v36 = vmax.f32 %v523_v27, 0.0  ;;  %v520_v41 = vsub.f32 %v488_v35, %v504_v25  ;;  %v2686_v42 = vld [vmem:[%s2869_s19 + $0x1d0] sm:$0xff]   ;;  %v315_v23 = vadd.f32 %v314_v12, %v3035_v10 }
  0x52   : > { %2484 = vmatprep.subr.bf16.mxu1 %v2674_v48  ;;  %v413_v44 = vadd.f32 %v412_v38, %v411_v29  ;;  %v474_v46 = vmul.f32 0.25, %v301_v37  ;;  %v327_v27 = vadd.f32 %v326_v17, %v3041_v13  ;;  %v2701_v38 = vld [vmem:[%s2869_s19 + $0x270] sm:$0xff]  }
  0x53   : > { %v553_v39 = vadd.f32 1e-05, %v537_v34  ;;  %v555_v43 = vadd.f32 1e-05, %v539_v36  ;;  %v536_v48 = vmax.f32 %v520_v41, 0.0  ;;  %v320_v36 = vrot.slane %v3047_v15, 4 }
  0x54   : > { %2463 = vmatpush3.bf16.msra.mxu0 %v2675_v53  ;;  %v490_v50 = vmul.f32 0.25, %v413_v44  ;;  %v506_v51 = vmul.f32 %v474_v46, %v474_v46  ;;  %v2690_v53 = vld [vmem:[%s2869_s19 + $0x1c8] sm:$0xff]   ;;  %v586_v45 = vsub.f32 %v2971_v22, %v474_v46  ;;  %v365_v22 = vmul.f32 %v3035_v10, %v3035_v10 }
  0x55   : > { %2485 = vmatpush3.bf16.msra.mxu1 %v2676_v58  ;;  %2464 = vmatprep.subr.bf16.mxu0 %v2677_v63  ;;  %2773 = vrsqrt.f32 %v553_v39  ;;  %v552_v54 = vadd.f32 1e-05, %v536_v48  ;;  %v587_v63 = vsub.f32 %v2954_v4, %v2998_v11  ;;  %v328_v39 = vrot.slane %v327_v27, 2 }
  0x56   : > { %2486 = vmatprep.subr.bf16.mxu1 %v2678_v40  ;;  %2775 = vrsqrt.f32 %v555_v43  ;;  %v522_v56 = vsub.f32 %v490_v50, %v506_v51  ;;  %v2697_v40 = vld [vmem:[%s2869_s19 + $0x278] sm:$0xff]   ;;  %v602_v5 = vmax.f32 %v586_v45, 0.0  ;;  %v426_v24 = vrot.slane %v365_v22, 4  ;;  %v2703_v50 = vld [vmem:[%s2869_s19 + $0x230] sm:$0xff]  }
  0x57   : > { %2777 = vrsqrt.f32 %v552_v54  ;;  %v603_v3 = vmax.f32 %v587_v63, 0.0  ;;  %v329_v51 = vadd.f32 %v328_v39, %v327_v27  ;;  %v366_v54 = vmul.f32 %v3047_v15, %v3047_v15 }
  0x58   : > { %2465 = vmatpush3.bf16.msra.mxu0 %v2679_v9  ;;  %v538_v58 = vmax.f32 %v522_v56, 0.0  ;;  %v600_v9 = vmax.f32 %v584_v33, 0.0  ;;  %v427_v34 = vadd.f32 %v426_v24, %v365_v22  ;;  %v2709_v22 = vld [vmem:[%s2869_s19 + $0x260] sm:$0xff]  }
  0x59   : > { %2487 = vmatpush3.bf16.msra.mxu1 %v2680_v14  ;;  %2466 = vmatprep.subr.bf16.mxu0 %v2681_v18  ;;  %v3044_v14 = vld [vmem:[%s2905_s23 + $0x40] sm:$0xff]  ;;  %v367_v18 = vmul.f32 %v3041_v13, %v3041_v13  ;;  %v330_v60 = vrot.slane %v329_v51, 1  ;;  %v432_v12 = vrot.slane %v366_v54, 4 }
  0x5a   : > { %2488 = vmatprep.subr.bf16.mxu1 %v2682_v21  ;;  %v554_v0 = vadd.f32 1e-05, %v538_v58  ;;  %v308_v19 = vrot.slane %v3044_v14, 4  ;;  %v364_v25 = vmul.f32 %v3044_v14, %v3044_v14  ;;  %v428_v44 = vrot.slane %v427_v34, 2 }
  0x5b   : > { %v438_v28 = vrot.slane %v367_v18, 4  ;;  %v331_v45 = vadd.f32 %v330_v60, %v329_v51 }
  0x5c   : > { %2467 = vmatpush3.bf16.msra.mxu0 %v2683_v26  ;;  %2779 = vrsqrt.f32 %v554_v0  ;;  %v309_v29 = vadd.f32 %v308_v19, %v3044_v14  ;;  %v420_v35 = vrot.slane %v364_v25, 4 }
  0x5d   : > { %2489 = vmatpush3.bf16.msra.mxu1 %v2684_v30  ;;  %2468 = vmatprep.subr.bf16.mxu0 %v2685_v31  ;;  %v2699_v30 = vld [vmem:[%s2869_s19 + $0x238] sm:$0xff]   ;;  %v316_v31 = vrot.slane %v315_v23, 2  ;;  %v439_v41 = vadd.f32 %v438_v28, %v367_v18  ;;  %v3081_v17 = vmul.f32 0.25, %v331_v45  ;;  %v2727_v45 = vld [vmem:[%s2869_s19 + $0x200] sm:$0xff]  }
  0x5e   : > { %2490 = vmatprep.subr.bf16.mxu1 %v2686_v42  ;;  %v310_v42 = vrot.slane %v309_v29, 2  ;;  %v421_v46 = vadd.f32 %v420_v35, %v364_v25  ;;  %v2708_v25 = vld [vmem:[%s2869_s19 + $0x2a8] sm:$0xff]  }
  0x5f   : > { %v317_v43 = vadd.f32 %v316_v31, %v315_v23  ;;  %v511_v27 = vmul.f32 %v3081_v17, %v3081_v17 }
  0x60   : > { %2469 = vmatpush3.bf16.msra.mxu0 %v2687_v47  ;;  %v321_v47 = vadd.f32 %v320_v36, %v3047_v15  ;;  %v422_v58 = vrot.slane %v421_v46, 2 }
  0x61   : > { %2491 = vmatpush3.bf16.msra.mxu1 %v2688_v49  ;;  %2470 = vmatprep.subr.bf16.mxu0 %v2689_v52  ;;  %v2700_v49 = vld [vmem:[%s2869_s19 + $0x2b8] sm:$0xff]   ;;  %v440_v52 = vrot.slane %v439_v41, 2  ;;  %v318_v56 = vrot.slane %v317_v43, 1 }
  0x62   : > { %2492 = vmatprep.subr.bf16.mxu1 %v2690_v53  ;;  %v2774_v4 = vpop.eup %2773  ;;  %v311_v53 = vadd.f32 %v310_v42, %v309_v29  ;;  %v322_v63 = vrot.slane %v321_v47, 2  ;;  %v2711_v29 = vld [vmem:[%s2869_s19 + $0x220] sm:$0xff]  }
  0x63   : > { %v2776_v7 = vpop.eup %2775  ;;  %v617_v8 = vmul.f32 %v2774_v4, %v601_v2  ;;  %v319_v2 = vadd.f32 %v318_v56, %v317_v43  ;;  %v2712_v42 = vld [vmem:[%s2869_s19 + $0x2a0] sm:$0xff]   ;;  %v2715_v43 = vld [vmem:[%s2869_s19 + $0x218] sm:$0xff]  }
  0x64   : > { %2471 = vmatpush3.bf16.msra.mxu0 %v2691_v55  ;;  %v619_v11 = vmul.f32 %v2776_v7, %v603_v3  ;;  %v2778_v20 = vpop.eup %2777  ;;  %v2704_v3 = vld [vmem:[%s2869_s19 + $0x2b0] sm:$0xff]   ;;  %v323_v7 = vadd.f32 %v322_v63, %v321_v47 }
  0x65   : > { %2493 = vmatpush3.bf16.msra.mxu1 %v2692_v57  ;;  %2472 = vmatprep.subr.bf16.mxu0 %v2693_v59  ;;  %v2369_v16 = vpack.c.bf16 %v617_v8, %v617_v8  ;;  %v616_v26 = vmul.f32 %v2778_v20, %v600_v9  ;;  %v429_v57 = vadd.f32 %v428_v44, %v427_v34  ;;  %v2705_v59 = vld [vmem:[%s2869_s19 + $0x268] sm:$0xff]   ;;  %v2713_v34 = vld [vmem:[%s2869_s19 + $0x258] sm:$0xff]   ;;  %v2717_v44 = vld [vmem:[%s2869_s19 + $0x250] sm:$0xff]  }
  0x66   : > { %2494 = vmatprep.subr.bf16.mxu1 %v2694_v61  ;;  %v2375_v21 = vpack.c.bf16 %v619_v11, %v619_v11  ;;  %v441_v61 = vadd.f32 %v440_v52, %v439_v41  ;;  %v2707_v8 = vld [vmem:[%s2869_s19 + $0x228] sm:$0xff]   ;;  %v3078_v11 = vmul.f32 0.25, %v319_v2  ;;  %v324_v19 = vrot.slane %v323_v7, 1 }
  0x67   : > { %2370 = vmatprep.mubr.msk.bf16.mxu0 %vm2946_vm1, %v2369_v16  ;;  %v2372_v37 = vpack.c.bf16 %v616_v26, %v616_v26  ;;  %v430_v33 = vrot.slane %v429_v57, 1  ;;  %v2706_v20 = vld [vmem:[%s2869_s19 + $0x2e8] sm:$0xff]  }
  0x68   : > { %2473 = vmatpush3.bf16.msra.mxu0 %v2695_v62  ;;  %2376 = vmatprep.mubr.msk.bf16.mxu1 %vm2946_vm1, %v2375_v21  ;;  %v312_v62 = vrot.slane %v311_v53, 1  ;;  %v509_v23 = vmul.f32 %v3078_v11, %v3078_v11  ;;  %v325_v36 = vadd.f32 %v324_v19, %v323_v7  ;;  %v589_v2 = vsub.f32 %v3035_v10, %v3078_v11 }
  0x69   : > { %2495 = vmatpush3.bf16.msra.mxu1 %v2696_v1  ;;  %2502 = vmatprep.subr.bf16.mxu0 %v2697_v40  ;;  %v2780_v48 = vpop.eup %2779  ;;  %v2702_v1 = vld [vmem:[%s2869_s19 + $0x2f0] sm:$0xff]   ;;  %v423_v40 = vadd.f32 %v422_v58, %v421_v46  ;;  %v431_v9 = vadd.f32 %v430_v33, %v429_v57  ;;  %v2721_v58 = vld [vmem:[%s2869_s19 + $0x248] sm:$0xff]   ;;  %v591_v33 = vsub.f32 %v3041_v13, %v3081_v17 }
  0x6a   : > { %2524 = vmatprep.subr.bf16.mxu1 %v2698_v6  ;;  %v618_v55 = vmul.f32 %v2780_v48, %v602_v5  ;;  %v442_v6 = vrot.slane %v441_v61, 1  ;;  %v313_v4 = vadd.f32 %v312_v62, %v311_v53  ;;  %v2714_v53 = vld [vmem:[%s2869_s19 + $0x2d8] sm:$0xff]   ;;  %v2719_v57 = vld [vmem:[%s2869_s19 + $0x210] sm:$0xff]  }
  0x6b   : > { %2373 = vmatmul.mubr.msk.bf16.vlgmr.msra.gmra.mxu0 %vm2946_vm1, %v2372_v37  ;;  %v424_v5 = vrot.slane %v423_v40, 1  ;;  %v493_v21 = vmul.f32 0.25, %v431_v9  ;;  %v433_v37 = vadd.f32 %v432_v12, %v366_v54  ;;  %v2720_v62 = vld [vmem:[%s2869_s19 + $0x290] sm:$0xff]   ;;  %v605_v9 = vmax.f32 %v589_v2, 0.0 }
  0x6c   : > { %2503 = vmatpush3.bf16.msra.mxu0 %v2699_v30  ;;  %v2378_v0 = vpack.c.bf16 %v618_v55, %v618_v55  ;;  %v443_v16 = vadd.f32 %v442_v6, %v441_v61  ;;  %v3083_v18 = vmul.f32 0.25, %v313_v4  ;;  %v2716_v55 = vld [vmem:[%s2869_s19 + $0x298] sm:$0xff]   ;;  %v2718_v61 = vld [vmem:[%s2869_s19 + $0x2d0] sm:$0xff]   ;;  %v2724_v4 = vld [vmem:[%s2869_s19 + $0x288] sm:$0xff]   ;;  %v607_v10 = vmax.f32 %v591_v33, 0.0 }
  0x6d   : > { %2504 = vmatprep.subr.bf16.mxu0 %v2701_v38  ;;  %v425_v24 = vadd.f32 %v424_v5, %v423_v40  ;;  %v525_v30 = vsub.f32 %v493_v21, %v509_v23  ;;  %v2710_v38 = vld [vmem:[%s2869_s19 + $0x2e0] sm:$0xff]   ;;  %v434_v47 = vrot.slane %v433_v37, 2  ;;  %v3126_v21 = vld [vmem:[%s2905_s23 + $0x78] sm:$0xff] }
  0x6e   : > { %2379 = vmatmul.mubr.msk.bf16.vlgmr.msra.gmra.mxu1 %vm2946_vm1, %v2378_v0  ;;  %v495_v26 = vmul.f32 0.25, %v443_v16  ;;  %v508_v28 = vmul.f32 %v3083_v18, %v3083_v18  ;;  %v2722_v0 = vld [vmem:[%s2869_s19 + $0x2c8] sm:$0xff]   ;;  %v2725_v40 = vld [vmem:[%s2869_s19 + $0x240] sm:$0xff]   ;;  %v588_v6 = vsub.f32 %v3044_v14, %v3083_v18 }
  0x6f   : > { %2525 = vmatpush3.bf16.msra.mxu1 %v2700_v49  ;;  %v492_v31 = vmul.f32 0.25, %v425_v24  ;;  %v541_v39 = vmax.f32 %v525_v30, 0.0  ;;  %v435_v52 = vadd.f32 %v434_v47, %v433_v37  ;;  %v2726_v5 = vld [vmem:[%s2869_s19 + $0x2c0] sm:$0xff]  }
  0x70   : > { %2505 = vmatpush3.bf16.msra.mxu0 %v2703_v50  ;;  %2526 = vmatprep.subr.bf16.mxu1 %v2702_v1  ;;  %v527_v35 = vsub.f32 %v495_v26, %v511_v27  ;;  %v478_v50 = vmul.f32 0.25, %v325_v36  ;;  %v2723_v1 = vld [vmem:[%s2869_s19 + $0x208] sm:$0xff]   ;;  %v604_v12 = vmax.f32 %v588_v6, 0.0  ;;  %v2728_v18 = vld [vmem:[%s2869_s19 + $0x280] sm:$0xff]  }
  0x71   : > { %2506 = vmatprep.subr.bf16.mxu0 %v2705_v59  ;;  %v524_v41 = vsub.f32 %v492_v31, %v508_v28  ;;  %v557_v48 = vadd.f32 1e-05, %v541_v39  ;;  %v436_v56 = vrot.slane %v435_v52, 1  ;;  %v3133_v28 = vld [vmem:[%s2905_s23 + $0x60] sm:$0xff]  ;;  %v2731_v31 = vld [vmem:[%s2869_s19 + $0x338] sm:$0xff]  }
  0x72   : > { %v543_v46 = vmax.f32 %v527_v35, 0.0  ;;  %v510_v60 = vmul.f32 %v478_v50, %v478_v50  ;;  %v590_v11 = vsub.f32 %v3047_v15, %v478_v50  ;;  %v3123_v15 = vld [vmem:[%s2905_s23 + $0x68] sm:$0xff]  ;;  %v371_v35 = vmul.f32 %v3126_v21, %v3126_v21 }
  0x73   : > { %2527 = vmatpush3.bf16.msra.mxu1 %v2704_v3  ;;  %v540_v49 = vmax.f32 %v524_v41, 0.0  ;;  %2781 = vrsqrt.f32 %v557_v48  ;;  %v437_v59 = vadd.f32 %v436_v56, %v435_v52  ;;  %v338_v26 = vrot.slane %v3123_v15, 4  ;;  %v2735_v52 = vld [vmem:[%s2869_s19 + $0x330] sm:$0xff]  }
  0x74   : > { %2507 = vmatpush3.bf16.msra.mxu0 %v2707_v8  ;;  %2528 = vmatprep.subr.bf16.mxu1 %v2706_v20  ;;  %v559_v51 = vadd.f32 1e-05, %v543_v46  ;;  %v2729_v8 = vld [vmem:[%s2869_s19 + $0x378] sm:$0xff]   ;;  %v3120_v20 = vmax.f32 %v590_v11, 0.0  ;;  %v369_v27 = vmul.f32 %v3123_v15, %v3123_v15  ;;  %v332_v36 = vrot.slane %v3133_v28, 4 }
  0x75   : > { %2508 = vmatprep.subr.bf16.mxu0 %v2709_v22  ;;  %v556_v54 = vadd.f32 1e-05, %v540_v49  ;;  %v494_v63 = vmul.f32 0.25, %v437_v59  ;;  %v339_v39 = vadd.f32 %v338_v26, %v3123_v15 }
  0x76   : > { %2783 = vrsqrt.f32 %v559_v51  ;;  %v450_v41 = vrot.slane %v369_v27, 4  ;;  %v333_v46 = vadd.f32 %v332_v36, %v3133_v28 }
  0x77   : > { %2529 = vmatpush3.bf16.msra.mxu1 %v2708_v25  ;;  %2785 = vrsqrt.f32 %v556_v54  ;;  %v526_v3 = vsub.f32 %v494_v63, %v510_v60  ;;  %v2730_v25 = vld [vmem:[%s2869_s19 + $0x3f8] sm:$0xff]   ;;  %v340_v48 = vrot.slane %v339_v39, 2 }
  0x78   : > { %2509 = vmatpush3.bf16.msra.mxu0 %v2711_v29  ;;  %2530 = vmatprep.subr.bf16.mxu1 %v2710_v38  ;;  %v3136_v29 = vld [vmem:[%s2905_s23 + $0x70] sm:$0xff]  ;;  %v451_v49 = vadd.f32 %v450_v41, %v369_v27 }
  0x79   : > { %2510 = vmatprep.subr.bf16.mxu0 %v2713_v34  ;;  %v542_v7 = vmax.f32 %v526_v3, 0.0  ;;  %v350_v34 = vrot.slane %v3126_v21, 4  ;;  %v2733_v38 = vld [vmem:[%s2869_s19 + $0x370] sm:$0xff]   ;;  %v344_v47 = vrot.slane %v3136_v29, 4  ;;  %v370_v51 = vmul.f32 %v3136_v29, %v3136_v29 }
  0x7a   : > { %v452_v59 = vrot.slane %v451_v49, 2  ;;  %v2734_v27 = vld [vmem:[%s2869_s19 + $0x3f0] sm:$0xff]  }
  0x7b   : > { %2531 = vmatpush3.bf16.msra.mxu1 %v2712_v42  ;;  %v558_v13 = vadd.f32 1e-05, %v542_v7  ;;  %v368_v42 = vmul.f32 %v3133_v28, %v3133_v28  ;;  %v345_v56 = vadd.f32 %v344_v47, %v3136_v29  ;;  %v2738_v47 = vld [vmem:[%s2869_s19 + $0x3e8] sm:$0xff]  }
  0x7c   : > { %2511 = vmatpush3.bf16.msra.mxu0 %v2715_v43  ;;  %2532 = vmatprep.subr.bf16.mxu1 %v2714_v53  ;;  %v351_v43 = vadd.f32 %v350_v34, %v3126_v21  ;;  %v453_v33 = vadd.f32 %v452_v59, %v451_v49 }
  0x7d   : > { %2512 = vmatprep.subr.bf16.mxu0 %v2717_v44  ;;  %2787 = vrsqrt.f32 %v558_v13  ;;  %v462_v44 = vrot.slane %v371_v35, 4  ;;  %v444_v50 = vrot.slane %v368_v42, 4 }
  0x7e   : > { %v352_v53 = vrot.slane %v351_v43, 2  ;;  %v454_v11 = vrot.slane %v453_v33, 1 }
  0x7f   : > { %2533 = vmatpush3.bf16.msra.mxu1 %v2716_v55  ;;  %v463_v54 = vadd.f32 %v462_v44, %v371_v35  ;;  %v334_v55 = vrot.slane %v333_v46, 2  ;;  %v445_v60 = vadd.f32 %v444_v50, %v368_v42  ;;  %v2745_v35 = vld [vmem:[%s2869_s19 + $0x358] sm:$0xff]  }
  0x80   : > { %2513 = vmatpush3.bf16.msra.mxu0 %v2719_v57  ;;  %2534 = vmatprep.subr.bf16.mxu1 %v2718_v61  ;;  %v2782_v22 = vpop.eup %2781  ;;  %v2737_v57 = vld [vmem:[%s2869_s19 + $0x368] sm:$0xff]   ;;  %v456_v61 = vrot.slane %v370_v51, 4 }
  0x81   : > { %2514 = vmatprep.subr.bf16.mxu0 %v2721_v58  ;;  %v621_v16 = vmul.f32 %v2782_v22, %v605_v9  ;;  %v341_v58 = vadd.f32 %v340_v48, %v339_v39  ;;  %v464_v63 = vrot.slane %v463_v54, 2  ;;  %v2747_v48 = vld [vmem:[%s2869_s19 + $0x318] sm:$0xff]  }
  0x82   : > { %v457_v3 = vadd.f32 %v456_v61, %v370_v51  ;;  %v2742_v61 = vld [vmem:[%s2869_s19 + $0x3e0] sm:$0xff]  }
  0x83   : > { %2535 = vmatpush3.bf16.msra.mxu1 %v2720_v62  ;;  %v2784_v14 = vpop.eup %2783  ;;  %v2381_v23 = vpack.c.bf16 %v621_v16, %v621_v16  ;;  %v353_v62 = vadd.f32 %v352_v53, %v351_v43  ;;  %v342_v2 = vrot.slane %v341_v58, 1  ;;  %v2736_v43 = vld [vmem:[%s2869_s19 + $0x3b0] sm:$0xff]  }
  0x84   : > { %2515 = vmatpush3.bf16.msra.mxu0 %v2723_v1  ;;  %2536 = vmatprep.subr.bf16.mxu1 %v2722_v0  ;;  %v2786_v17 = vpop.eup %2785  ;;  %v623_v19 = vmul.f32 %v2784_v14, %v607_v10  ;;  %v335_v0 = vadd.f32 %v334_v55, %v333_v46  ;;  %v346_v1 = vrot.slane %v345_v56, 2  ;;  %v2741_v10 = vld [vmem:[%s2869_s19 + $0x360] sm:$0xff]  }
  0x85   : > { %2516 = vmatprep.subr.bf16.mxu0 %v2725_v40  ;;  %v620_v24 = vmul.f32 %v2786_v17, %v604_v12  ;;  %2382 = vmatprep.mubr.msk.bf16.mxu0 %vm2946_vm1, %v2381_v23  ;;  %v446_v40 = vrot.slane %v445_v60, 2  ;;  %v354_v6 = vrot.slane %v353_v62, 1  ;;  %v343_v13 = vadd.f32 %v342_v2, %v341_v58  ;;  %v2740_v58 = vld [vmem:[%s2869_s19 + $0x3a8] sm:$0xff]  }
  0x86   : > { %v2387_v30 = vpack.c.bf16 %v623_v19, %v623_v19  ;;  %v336_v7 = vrot.slane %v335_v0, 1  ;;  %v458_v12 = vrot.slane %v457_v3, 2  ;;  %v455_v19 = vadd.f32 %v454_v11, %v453_v33  ;;  %v2753_v2 = vld [vmem:[%s2869_s19 + $0x348] sm:$0xff]   ;;  %v2759_v11 = vld [vmem:[%s2869_s19 + $0x300] sm:$0xff]  }
  0x87   : > { %2537 = vmatpush3.bf16.msra.mxu1 %v2724_v4  ;;  %v2384_v37 = vpack.c.bf16 %v620_v24, %v620_v24  ;;  %v465_v4 = vadd.f32 %v464_v63, %v463_v54  ;;  %v355_v14 = vadd.f32 %v354_v6, %v353_v62  ;;  %v3165_v23 = vmul.f32 0.25, %v343_v13  ;;  %v2751_v62 = vld [vmem:[%s2869_s19 + $0x310] sm:$0xff]   ;;  %v2755_v6 = vld [vmem:[%s2869_s19 + $0x308] sm:$0xff]  }
  0x88   : > { %2517 = vmatpush3.bf16.msra.mxu0 %v2727_v45  ;;  %2538 = vmatprep.subr.bf16.mxu1 %v2726_v5  ;;  %v2739_v45 = vld [vmem:[%s2869_s19 + $0x328] sm:$0xff]   ;;  %v447_v5 = vadd.f32 %v446_v40, %v445_v60  ;;  %v337_v17 = vadd.f32 %v336_v7, %v335_v0  ;;  %v497_v36 = vmul.f32 0.25, %v455_v19  ;;  %v459_v51 = vadd.f32 %v458_v12, %v457_v3  ;;  %v2744_v3 = vld [vmem:[%s2869_s19 + $0x3a0] sm:$0xff]   ;;  %v2750_v13 = vld [vmem:[%s2869_s19 + $0x3d0] sm:$0xff]  }
  0x89   : > { %2546 = vmatprep.subr.bf16.mxu0 %v2729_v8  ;;  %2388 = vmatprep.mubr.msk.bf16.mxu1 %vm2946_vm1, %v2387_v30  ;;  %v347_v8 = vadd.f32 %v346_v1, %v345_v56  ;;  %v466_v16 = vrot.slane %v465_v4, 1  ;;  %v2743_v30 = vld [vmem:[%s2869_s19 + $0x320] sm:$0xff]   ;;  %v3169_v34 = vmul.f32 0.25, %v355_v14  ;;  %v2752_v14 = vld [vmem:[%s2869_s19 + $0x390] sm:$0xff]  }
  0x8a   : > { %v2788_v9 = vpop.eup %2787  ;;  %v448_v24 = vrot.slane %v447_v5, 1  ;;  %v460_v56 = vrot.slane %v459_v51, 1  ;;  %v2757_v7 = vld [vmem:[%s2869_s19 + $0x340] sm:$0xff]  }
  0x8b   : > { %2539 = vmatpush3.bf16.msra.mxu1 %v2728_v18  ;;  %2385 = vmatmul.mubr.msk.bf16.vlgmr.msra.gmra.mxu0 %vm2946_vm1, %v2384_v37  ;;  %v622_v22 = vmul.f32 %v2788_v9, %v3120_v20  ;;  %v2732_v18 = vld [vmem:[%s2869_s19 + $0x3b8] sm:$0xff]   ;;  %v3171_v20 = vmul.f32 0.25, %v337_v17  ;;  %v513_v37 = vmul.f32 %v3165_v23, %v3165_v23  ;;  %v515_v41 = vmul.f32 %v3169_v34, %v3169_v34 }
  0x8c   : > { %2568 = vmatprep.subr.bf16.mxu1 %v2730_v25  ;;  %2547 = vmatpush3.bf16.msra.mxu0 %v2731_v31  ;;  %v348_v25 = vrot.slane %v347_v8, 1  ;;  %v467_v31 = vadd.f32 %v466_v16, %v465_v4  ;;  %v461_v0 = vadd.f32 %v460_v56, %v459_v51  ;;  %v2748_v9 = vld [vmem:[%s2869_s19 + $0x398] sm:$0xff]   ;;  %v2763_v51 = vld [vmem:[%s235_s27 + $0x8] sm:$0xff]  }
  0x8d   : > { %2548 = vmatprep.subr.bf16.mxu0 %v2733_v38  ;;  %v2390_v26 = vpack.c.bf16 %v622_v22, %v622_v22  ;;  %v449_v38 = vadd.f32 %v448_v24, %v447_v5  ;;  %v512_v42 = vmul.f32 %v3171_v20, %v3171_v20  ;;  %v529_v44 = vsub.f32 %v497_v36, %v513_v37 }
  0x8e   : > { %v499_v39 = vmul.f32 0.25, %v467_v31  ;;  %v349_v50 = vadd.f32 %v348_v25, %v347_v8  ;;  %v498_v40 = vmul.f32 0.25, %v461_v0  ;;  %v595_v5 = vsub.f32 %v3126_v21, %v3169_v34  ;;  %v2756_v21 = vld [vmem:[%s2869_s19 + $0x388] sm:$0xff]  }
  0x8f   : > { %2391 = vmatmul.mubr.msk.bf16.vlgmr.msra.gmra.mxu1 %vm2946_vm1, %v2390_v26  ;;  %v496_v46 = vmul.f32 0.25, %v449_v38  ;;  %v545_v53 = vmax.f32 %v529_v44, 0.0  ;;  %v592_v22 = vsub.f32 %v3133_v28, %v3171_v20  ;;  %v2758_v26 = vld [vmem:[%s2869_s19 + $0x3c0] sm:$0xff]   ;;  %v2762_v44 = vld [vmem:[%s235_s27 + $0x10] sm:$0xff]  }
  0x90   : > { %2549 = vmatpush3.bf16.msra.mxu0 %v2735_v52  ;;  %2569 = vmatpush3.bf16.msra.mxu1 %v2732_v18  ;;  %v531_v49 = vsub.f32 %v499_v39, %v515_v41  ;;  %v2749_v52 = vld [vmem:[%s2869_s19 + $0x350] sm:$0xff]   ;;  %v611_v17 = vmax.f32 %v595_v5, 0.0  ;;  %v2760_v20 = vld [vmem:[%s2869_s19 + $0x380] sm:$0xff]   ;;  %v2823_v39 = vmov 0.0   ;;  %v2761_v41 = vld [vmem:[%s235_s27 + $0x18] sm:$0xff]  }
  0x91   : > { %2550 = vmatprep.subr.bf16.mxu0 %v2737_v57  ;;  %2570 = vmatprep.subr.bf16.mxu1 %v2734_v27  ;;  %v528_v54 = vsub.f32 %v496_v46, %v512_v42  ;;  %v3186_v57 = vmul.f32 0.25, %v349_v50  ;;  %v561_v59 = vadd.f32 1e-05, %v545_v53  ;;  %v608_v18 = vmax.f32 %v592_v22, 0.0 }
  0x92   : > { %v547_v55 = vmax.f32 %v531_v49, 0.0 }
  0x93   : > { %v544_v60 = vmax.f32 %v528_v54, 0.0  ;;  %v514_v1 = vmul.f32 %v3186_v57, %v3186_v57  ;;  %2789 = vrsqrt.f32 %v561_v59  ;;  %v594_v27 = vsub.f32 %v3136_v29, %v3186_v57 }
  0x94   : > { %2551 = vmatpush3.bf16.msra.mxu0 %v2739_v45  ;;  %2571 = vmatpush3.bf16.msra.mxu1 %v2736_v43  ;;  %v563_v63 = vadd.f32 1e-05, %v547_v55  ;;  %v2746_v45 = vld [vmem:[%s2869_s19 + $0x3d8] sm:$0xff]   ;;  %v2764_v55 = vld [vmem:[%s235_s27] sm:$0xff]  }
  0x95   : > { %2552 = vmatprep.subr.bf16.mxu0 %v2741_v10  ;;  %2572 = vmatprep.subr.bf16.mxu1 %v2738_v47  ;;  %v560_v33 = vadd.f32 1e-05, %v544_v60  ;;  %v530_v4 = vsub.f32 %v498_v40, %v514_v1  ;;  %v593_v10 = vsub.f32 %v3123_v15, %v3165_v23  ;;  %v2754_v15 = vld [vmem:[%s2869_s19 + $0x3c8] sm:$0xff]   ;;  %v610_v36 = vmax.f32 %v594_v27, 0.0 }
  0x96   : > { %2791 = vrsqrt.f32 %v563_v63 }
  0x97   : > { %2793 = vrsqrt.f32 %v560_v33  ;;  %v546_v8 = vmax.f32 %v530_v4, 0.0  ;;  %v609_v16 = vmax.f32 %v593_v10, 0.0 }
  0x98   : > { %2553 = vmatpush3.bf16.msra.mxu0 %v2743_v30  ;;  %2573 = vmatpush3.bf16.msra.mxu1 %v2740_v58 }
  0x99   : > { %2554 = vmatprep.subr.bf16.mxu0 %v2745_v35  ;;  %2574 = vmatprep.subr.bf16.mxu1 %v2742_v61  ;;  %v562_v12 = vadd.f32 1e-05, %v546_v8 }
  0x9b   : > { %2795 = vrsqrt.f32 %v562_v12 }
  0x9c   : > { %2555 = vmatpush3.bf16.msra.mxu0 %v2747_v48  ;;  %2575 = vmatpush3.bf16.msra.mxu1 %v2744_v3 }
  0x9d   : > { %2556 = vmatprep.subr.bf16.mxu0 %v2749_v52  ;;  %2576 = vmatprep.subr.bf16.mxu1 %v2746_v45 }
  0xa0   : > { %2557 = vmatpush3.bf16.msra.mxu0 %v2751_v62  ;;  %2577 = vmatpush3.bf16.msra.mxu1 %v2748_v9  ;;  %v2790_v19 = vpop.eup %2789 }
  0xa1   : > { %2558 = vmatprep.subr.bf16.mxu0 %v2753_v2  ;;  %2578 = vmatprep.subr.bf16.mxu1 %v2750_v13  ;;  %v625_v24 = vmul.f32 %v2790_v19, %v609_v16 }
  0xa3   : > { %v2792_v23 = vpop.eup %2791  ;;  %v2393_v30 = vpack.c.bf16 %v625_v24, %v625_v24 }
  0xa4   : > { %2559 = vmatpush3.bf16.msra.mxu0 %v2755_v6  ;;  %2579 = vmatpush3.bf16.msra.mxu1 %v2752_v14  ;;  %v2794_v25 = vpop.eup %2793  ;;  %v627_v28 = vmul.f32 %v2792_v23, %v611_v17 }
  0xa5   : > { %2560 = vmatprep.subr.bf16.mxu0 %v2757_v7  ;;  %2580 = vmatprep.subr.bf16.mxu1 %v2754_v15  ;;  %v624_v31 = vmul.f32 %v2794_v25, %v608_v18 }
  0xa6   : > { %v2399_v34 = vpack.c.bf16 %v627_v28, %v627_v28  ;;  %2394 = vmatprep.mubr.msk.bf16.mxu0 %vm2946_vm1, %v2393_v30 }
  0xa7   : > { %v2396_v35 = vpack.c.bf16 %v624_v31, %v624_v31 }
  0xa8   : > { %2561 = vmatpush3.bf16.msra.mxu0 %v2759_v11  ;;  %2581 = vmatpush3.bf16.msra.mxu1 %v2756_v21  ;;  %v2796_v37 = vpop.eup %2795 }
  0xa9   : > { %2582 = vmatprep.subr.bf16.mxu1 %v2758_v26  ;;  %2400 = vmatprep.mubr.msk.bf16.mxu1 %vm2946_vm1, %v2399_v34  ;;  %v626_v29 = vmul.f32 %v2796_v37, %v610_v36 }
  0xaa   : > { %2595 = vmatprep.subr.bf16.mxu0 %v2823_v39 }
  0xab   : > { %2397 = vmatmul.mubr.msk.bf16.vlgmr.msra.gmra.mxu0 %vm2946_vm1, %v2396_v35  ;;  %v2402_v38 = vpack.c.bf16 %v626_v29, %v626_v29 }
  0xac   : > { %2583 = vmatpush3.bf16.msra.mxu1 %v2760_v20  ;;  %2603 = vmatprep.mubr.msk.bf16.mxu0 %vm2824_vm2, %v2823_v39 }
  0xad   : > { %2596 = vmatpush3.bf16.msra.mxu0 %v2761_v41 }
  0xae   : > { %2597 = vmatprep.subr.bf16.mxu0 %v2823_v39 }
  0xaf   : > { %2403 = vmatmul.mubr.msk.bf16.vlgmr.msra.gmra.mxu1 %vm2946_vm1, %v2402_v38 }
  0xb1   : > { %2598 = vmatpush3.bf16.msra.mxu0 %v2762_v44 }
  0xb2   : > { %2599 = vmatprep.subr.bf16.mxu0 %v2823_v39 }
  0xb5   : > { %2600 = vmatpush3.bf16.msra.mxu0 %v2763_v51 }
  0xb6   : > { %2601 = vmatprep.subr.bf16.mxu0 %v2823_v39 }
  0xb9   : > { %2602 = vmatpush3.bf16.msra.mxu0 %v2764_v55 }
 0x10b   : > { %v2430_v42 = vpop.f32.mrf.mxu0 }
 0x10c   : > { %v2452_v43 = vpop.f32.mrf.mxu1 }
 0x10d   : > { %v2431_v46 = vpop.f32.mrf.mxu0 }
 0x10e   : > { %v2432_v47 = vadd.f32 %v2431_v46, %v2430_v42  ;;  %v2453_v48 = vpop.f32.mrf.mxu1 }
 0x10f   : > { %v2454_v32 = vadd.f32 %v2453_v48, %v2452_v43  ;;  %v2433_v49 = vpop.f32.mrf.mxu0 }
 0x110   : > { %v2455_v50 = vpop.f32.mrf.mxu1 }
 0x111   : > { %v1764_v52 = vadd.f32 %v2454_v32, %v2432_v47  ;;  %v2434_v53 = vpop.f32.mrf.mxu0 }
 0x112   : > { %v2456_v54 = vpop.f32.mrf.mxu1 }
 0x12b   : > { %v2474_v56 = vpop.f32.mrf.mxu0 }
 0x12d   : > { %v2475_v57 = vpop.f32.mrf.mxu0 }
 0x12e   : > { %v2476_v58 = vadd.f32 %v2475_v57, %v2474_v56  ;;  %v2496_v60 = vpop.f32.mrf.mxu1 }
 0x12f   : > { %v2477_v59 = vpop.f32.mrf.mxu0 }
 0x130   : > { %v1804_v61 = vadd.f32 %v2476_v58, %v1764_v52  ;;  %v2497_v63 = vpop.f32.mrf.mxu1 }
 0x131   : > { %v2478_v62 = vpop.f32.mrf.mxu0  ;;  %v2498_v0 = vadd.f32 %v2497_v63, %v2496_v60 }
 0x132   : > { %v2499_v1 = vpop.f32.mrf.mxu1 }
 0x133   : > { %v1844_v2 = vadd.f32 %v2498_v0, %v1804_v61 }
 0x134   : > { %v2500_v33 = vpop.f32.mrf.mxu1 }
 0x14b   : > { %v2518_v40 = vpop.f32.mrf.mxu0 }
 0x14d   : > { %v2519_v3 = vpop.f32.mrf.mxu0 }
 0x14e   : > { %v2520_v10 = vadd.f32 %v2519_v3, %v2518_v40 }
 0x14f   : > { %v2521_v45 = vpop.f32.mrf.mxu0  ;;  %v2540_v4 = vpop.f32.mrf.mxu1 }
 0x150   : > { %v1884_v11 = vadd.f32 %v2520_v10, %v1844_v2 }
 0x151   : > { %v2522_v6 = vpop.f32.mrf.mxu0  ;;  %v2541_v7 = vpop.f32.mrf.mxu1 }
 0x152   : > { %v2542_v5 = vadd.f32 %v2541_v7, %v2540_v4 }
 0x153   : > { %v2543_v8 = vpop.f32.mrf.mxu1 }
 0x154   : > { %v1924_v16 = vadd.f32 %v2542_v5, %v1884_v11 }
 0x155   : > { %v2544_v9 = vpop.f32.mrf.mxu1 }
 0x16b   : > { %v2562_v13 = vpop.f32.mrf.mxu0 }
 0x16d   : > { %v2563_v12 = vpop.f32.mrf.mxu0 }
 0x16e   : > { %v2564_v22 = vadd.f32 %v2563_v12, %v2562_v13 }
 0x16f   : > { %v2565_v14 = vpop.f32.mrf.mxu0  ;;  %v2584_v17 = vpop.f32.mrf.mxu1 }
 0x170   : > { %v1964_v18 = vadd.f32 %v2564_v22, %v1924_v16 }
 0x171   : > { %v2566_v15 = vpop.f32.mrf.mxu0  ;;  %v2585_v19 = vpop.f32.mrf.mxu1 }
 0x172   : > { %v2586_v23 = vadd.f32 %v2585_v19, %v2584_v17 }
 0x173   : > { %v2587_v21 = vpop.f32.mrf.mxu1 }
 0x174   : > { %v2004_v24 = vadd.f32 %v2586_v23, %v1964_v18 }
 0x175   : > { %v2588_v25 = vpop.f32.mrf.mxu1 }
 0x176   : > { %v2017_v26 = vmul.f32 %v2004_v24, %v2004_v24  ;;  %v2010_v28 = vsel %vm2009_vm3, %v2004_v24, 0.0 }
 0x177   : > { %v2011_v27 = vrot.slane %v2010_v28, 4 }
 0x178   : > { %v2018_v30 = vsel %vm2009_vm3, %v2017_v26, 0.0 }
 0x179   : > { %v2012_v31 = vadd.f32 %v2011_v27, %v2010_v28  ;;  %v2019_v34 = vrot.slane %v2018_v30, 4 }
 0x17b   : > { %v2013_v20 = vrot.slane %v2012_v31, 2  ;;  %v2020_v35 = vadd.f32 %v2019_v34, %v2018_v30 }
 0x17d   : > { %v2014_v36 = vadd.f32 %v2013_v20, %v2012_v31  ;;  %v2021_v37 = vrot.slane %v2020_v35, 2 }
 0x17f   : > { %v2015_v29 = vrot.slane %v2014_v36, 1  ;;  %v2022_v38 = vadd.f32 %v2021_v37, %v2020_v35 }
 0x181   : > { %v2016_v39 = vadd.f32 %v2015_v29, %v2014_v36  ;;  %v2023_v41 = vrot.slane %v2022_v38, 1 }
 0x183   : > { %v2024_v42 = vadd.f32 %v2023_v41, %v2022_v38  ;;  %v2025_v43 = vmul.f32 0.25, %v2016_v39 }
 0x185   : > { %v2026_v44 = vmul.f32 0.25, %v2024_v42  ;;  %v2027_v46 = vmul.f32 %v2025_v43, %v2025_v43  ;;  %v2032_v49 = vsub.f32 %v2004_v24, %v2025_v43 }
 0x187   : > { %v2028_v47 = vsub.f32 %v2026_v44, %v2027_v46  ;;  %v2033_v50 = vmax.f32 %v2032_v49, 0.0 }
 0x189   : > { %v2029_v48 = vmax.f32 %v2028_v47, 0.0 }
 0x18b   : > { %v2030_v32 = vadd.f32 1e-05, %v2029_v48 }
 0x18d   : > { %2797 = vrsqrt.f32 %v2030_v32 }
 0x19a   : > { %v2798_v51 = vpop.eup %2797 }
 0x19b   : > { %v2034_v52 = vmul.f32 %v2798_v51, %v2033_v50 }
 0x19d   : > { %v2035_v53 = vpack.c.bf16 %v2034_v52, %v2034_v52 }
 0x19f   : > { %2604 = vmatmul.mubr.msk.bf16.vlgmr.msra.gmra.mxu0 %vm2009_vm3, %v2035_v53 }
 0x25f   : > { %v2105_v54 = vpop.f32.mrf.mxu0 }
 0x260   : > { %2111 = vst [vmem:[%s242_s4] sm:$0xff] %v2105_v54 }
 0x261   : > { %v2605_v55 = vpop.f32.mrf.mxu0 }
 0x263   : > { %v2108_v56 = vpop.f32.mrf.mxu0 }
 0x265   : > { %v2606_v57 = vpop.f32.mrf.mxu0 }
 0x266 PF: > { %s13_s14 = sadd.s32 1, %s2821_s14   ;;  %s3248_s12 = smov %s2817_s13 }
 0x267   : > { %p10_p5 = scmp.ge.s32.totalorder %s13_s14, 4   ;;  %s3249_s13 = smov %s3251_s15 }
 0x269   :  { %12 = sbr.rel (!%p10_p5) target bundleno = 2 (0x2), region = 68 }

</bundles_post_ra>
